<compile_context>
chip_gen: v7x
topology: tpu7x:2x2x1
jax: 0.10.0
libtpu: 0.0.40
codegen_flags: <defaults>
</compile_context>

<pallas_src>
import jax
import jax.numpy as jnp
from jax.experimental import pallas as pl
from jax.experimental.pallas import tpu as pltpu


def _round_up(v, m):
    return ((v + m - 1) // m) * m


# ----------------------------- kernels --------------------------------------


def gcn_fused_kernel(a_ref, x_ref, w1_ref, b1_ref, w2p_ref, b2_ref, out_ref):
    """Whole graph resident: log_softmax(A @ relu((A@X)@W1 + b1) @ W2p + b2p)."""
    a = a_ref[...]
    # (A @ X) first: contracts N^2 against input_dim (< hidden_dim).
    ax = jnp.dot(a, x_ref[...], preferred_element_type=jnp.float32)
    h = jnp.dot(ax.astype(jnp.bfloat16), w1_ref[...],
                preferred_element_type=jnp.float32) + b1_ref[...]
    h = jnp.maximum(h, 0.0)  # ReLU in f32
    # Dropout(p=0.6): inference-mode semantics (identity).
    # TODO(synk): training-mode dropout would use pltpu.prng_seed/prng_random_bits.
    hw2 = jnp.dot(h.astype(jnp.bfloat16), w2p_ref[...],
                  preferred_element_type=jnp.float32)
    z = jnp.dot(a, hw2.astype(jnp.bfloat16),
                preferred_element_type=jnp.float32) + b2_ref[...]
    # Padded logit columns carry a -1e30 bias -> exp underflows to 0, so the
    # row-wise log-softmax over the 128-lane slab equals the real one.
    m = jnp.max(z, axis=1, keepdims=True)
    e = jnp.exp(z - m)
    lse = m + jnp.log(jnp.sum(e, axis=1, keepdims=True))
    out_ref[...] = (z - lse).astype(out_ref.dtype)


def gcn_layer1_kernel(a_ref, x_ref, w1_ref, b1_ref, w2p_ref, hw2_ref):
    """Per row-tile: HW2 = relu((A_tile @ X) @ W1 + b1) @ W2_pad."""
    ax = jnp.dot(a_ref[...], x_ref[...], preferred_element_type=jnp.float32)
    h = jnp.dot(ax.astype(jnp.bfloat16), w1_ref[...],
                preferred_element_type=jnp.float32) + b1_ref[...]
    h = jnp.maximum(h, 0.0)
    # Dropout(p=0.6): inference-mode identity (see TODO above).
    hw2_ref[...] = jnp.dot(h.astype(jnp.bfloat16), w2p_ref[...],
                           preferred_element_type=jnp.float32).astype(hw2_ref.dtype)


def gcn_layer2_kernel(a_ref, hw2_ref, b2_ref, out_ref):
    """Per row-tile: log_softmax(A_tile @ (H @ W2_pad) + b2_pad)."""
    z = jnp.dot(a_ref[...], hw2_ref[...],
                preferred_element_type=jnp.float32) + b2_ref[...]
    m = jnp.max(z, axis=1, keepdims=True)
    e = jnp.exp(z - m)
    lse = m + jnp.log(jnp.sum(e, axis=1, keepdims=True))
    out_ref[...] = (z - lse).astype(out_ref.dtype)


# ----------------------------- glue -----------------------------------------


def build_normalized_adjacency(edge_index, num_nodes):
    """Dense D^-1/2 (A + I) D^-1/2, matching GCNConv's symmetric gcn_norm.

    Built once per (static) graph and cached by the caller."""
    src, dst = edge_index[0], edge_index[1]
    a = jnp.zeros((num_nodes, num_nodes), jnp.float32)
    a = a.at[dst, src].add(1.0)                     # message flows src -> dst
    a = a + jnp.eye(num_nodes, dtype=jnp.float32)   # add self loops
    deg = jnp.sum(a, axis=1)
    d_inv_sqrt = jnp.where(deg > 0, jax.lax.rsqrt(deg), 0.0)
    return a * d_inv_sqrt[:, None] * d_inv_sqrt[None, :]


def _compiler_params(semantics):
    return pltpu.CompilerParams(
        dimension_semantics=semantics,
        vmem_limit_bytes=64 * 1024 * 1024,
    )


@jax.jit
def gcn_forward(a_norm, x, w1, b1, w2, b2):
    n, in_dim = x.shape
    hid = w1.shape[1]
    out_dim = w2.shape[1]
    out_pad = _round_up(out_dim, 128)               # lane-dense output slab

    fused = n <= 1024                               # whole graph fits VMEM
    if fused:
        tm = _round_up(n, 8)
        n_pad = tm
    else:
        tm = 512                                    # biggest clean row tile
        n_pad = _round_up(n, tm)

    # bf16 MXU inputs, f32 accumulation inside the kernels.
    a_bf = a_norm.astype(jnp.bfloat16)
    x_bf = x.astype(jnp.bfloat16)
    if n_pad != n:
        a_bf = jnp.zeros((n_pad, n_pad), jnp.bfloat16).at[:n, :n].set(a_bf)
        x_bf = jnp.zeros((n_pad, in_dim), jnp.bfloat16).at[:n, :].set(x_bf)

    w1_bf = w1.astype(jnp.bfloat16)
    w2_pad = jnp.zeros((hid, out_pad), jnp.bfloat16).at[:, :out_dim].set(
        w2.astype(jnp.bfloat16))
    b1_r = b1.reshape(1, hid).astype(jnp.float32)
    # Padded logit columns get a huge negative bias -> drop out of the softmax.
    b2_pad = jnp.full((1, out_pad), -1e30, jnp.float32).at[0, :out_dim].set(
        b2.astype(jnp.float32))

    if fused:
        z = pl.pallas_call(
            gcn_fused_kernel,
            out_shape=jax.ShapeDtypeStruct((n_pad, out_pad), jnp.float32),
            grid_spec=pltpu.PrefetchScalarGridSpec(
                num_scalar_prefetch=0,
                grid=(1,),
                in_specs=[
                    pl.BlockSpec((n_pad, n_pad), lambda i: (0, 0)),   # A
                    pl.BlockSpec((n_pad, in_dim), lambda i: (0, 0)),  # X
                    pl.BlockSpec((in_dim, hid), lambda i: (0, 0)),    # W1
                    pl.BlockSpec((1, hid), lambda i: (0, 0)),         # b1
                    pl.BlockSpec((hid, out_pad), lambda i: (0, 0)),   # W2 (padded)
                    pl.BlockSpec((1, out_pad), lambda i: (0, 0)),     # b2 (padded)
                ],
                out_specs=pl.BlockSpec((n_pad, out_pad), lambda i: (0, 0)),
            ),
            compiler_params=_compiler_params(("arbitrary",)),
            cost_estimate=pl.CostEstimate(
                flops=2 * n_pad * n_pad * (in_dim + out_pad)
                + 2 * n_pad * hid * (in_dim + out_pad),
                transcendentals=n_pad * out_pad + n_pad,
                bytes_accessed=2 * (n_pad * n_pad + n_pad * in_dim
                                    + in_dim * hid + hid * out_pad)
                + 4 * (hid + out_pad + n_pad * out_pad),
            ),
        )(a_bf, x_bf, w1_bf, b1_r, w2_pad, b2_pad)
        return z[:n, :out_dim]

    # ---- large graphs: two row-tiled kernels over node-row slabs of A ------
    grid = (n_pad // tm,)

    hw2 = pl.pallas_call(
        gcn_layer1_kernel,
        out_shape=jax.ShapeDtypeStruct((n_pad, out_pad), jnp.bfloat16),
        grid_spec=pltpu.PrefetchScalarGridSpec(
            num_scalar_prefetch=0,
            grid=grid,
            in_specs=[
                pl.BlockSpec((tm, n_pad), lambda i: (i, 0)),        # A row slab
                pl.BlockSpec((n_pad, in_dim), lambda i: (0, 0)),    # X (resident)
                pl.BlockSpec((in_dim, hid), lambda i: (0, 0)),      # W1
                pl.BlockSpec((1, hid), lambda i: (0, 0)),           # b1
                pl.BlockSpec((hid, out_pad), lambda i: (0, 0)),     # W2 (padded)
            ],
            out_specs=pl.BlockSpec((tm, out_pad), lambda i: (i, 0)),
        ),
        compiler_params=_compiler_params(("parallel",)),
        cost_estimate=pl.CostEstimate(
            flops=2 * n_pad * n_pad * in_dim + 2 * n_pad * in_dim * hid
            + 2 * n_pad * hid * out_pad,
            transcendentals=0,
            bytes_accessed=2 * (n_pad * n_pad + n_pad * in_dim + in_dim * hid
                                + hid * out_pad + n_pad * out_pad) + 4 * hid,
        ),
    )(a_bf, x_bf, w1_bf, b1_r, w2_pad)

    z = pl.pallas_call(
        gcn_layer2_kernel,
        out_shape=jax.ShapeDtypeStruct((n_pad, out_pad), jnp.float32),
        grid_spec=pltpu.PrefetchScalarGridSpec(
            num_scalar_prefetch=0,
            grid=grid,
            in_specs=[
                pl.BlockSpec((tm, n_pad), lambda i: (i, 0)),        # A row slab
                pl.BlockSpec((n_pad, out_pad), lambda i: (0, 0)),   # HW2 (resident)
                pl.BlockSpec((1, out_pad), lambda i: (0, 0)),       # b2 (padded)
            ],
            out_specs=pl.BlockSpec((tm, out_pad), lambda i: (i, 0)),
        ),
        compiler_params=_compiler_params(("parallel",)),
        cost_estimate=pl.CostEstimate(
            flops=2 * n_pad * n_pad * out_pad,
            transcendentals=n_pad * out_pad + n_pad,
            bytes_accessed=2 * (n_pad * n_pad + n_pad * out_pad)
            + 4 * (out_pad + n_pad * out_pad),
        ),
    )(a_bf, hw2, b2_pad)

    # TODO(synk): for very sparse real graphs, replace the dense A row slabs
    # with a CSR scalar-prefetch SpMM (PrefetchScalarGridSpec index_map gather).
    return z[:n, :out_dim]


def gcn_reference(a_norm, x, w1, b1, w2, b2):
    """Pure-JAX f32 reference for correctness checking."""
    h = a_norm @ (x @ w1) + b1
    h = jnp.maximum(h, 0.0)
    z = a_norm @ (h @ w2) + b2
    return jax.nn.log_softmax(z, axis=1)


def glorot(key, shape):
    fan_in, fan_out = shape
    limit = (6.0 / (fan_in + fan_out)) ** 0.5
    return jax.random.uniform(key, shape, jnp.float32, -limit, limit)


if __name__ == "__main__":
    # Small GCN: 16 nodes, input_dim=8, hidden_dim=32, output_dim=4
    num_nodes, input_dim, hidden_dim, output_dim = 16, 8, 32, 4

    key = jax.random.PRNGKey(0)
    k_x, k_w1, k_w2, k_e = jax.random.split(key, 4)

    # node features
    x = jax.random.normal(k_x, (num_nodes, input_dim), jnp.float32)

    # deterministic undirected graph: ring + a few extra edges (both directions)
    ring_src = jnp.arange(num_nodes)
    ring_dst = (ring_src + 1) % num_nodes
    extra_src = jnp.array([0, 3, 5, 7], dtype=jnp.int32)
    extra_dst = jnp.array([8, 11, 13, 15], dtype=jnp.int32)
    src = jnp.concatenate([ring_src, ring_dst, extra_src, extra_dst])
    dst = jnp.concatenate([ring_dst, ring_src, extra_dst, extra_src])
    edge_index = jnp.stack([src, dst]).astype(jnp.int32)  # [2, E]

    # parameters (deterministic init)
    w1 = glorot(k_w1, (input_dim, hidden_dim))
    b1 = jnp.zeros((hidden_dim,), jnp.float32)
    w2 = glorot(k_w2, (hidden_dim, output_dim))
    b2 = jnp.zeros((output_dim,), jnp.float32)

    # Build/cache the normalized adjacency ONCE (static graph), reuse per call.
    a_norm = build_normalized_adjacency(edge_index, num_nodes)
    a_norm = jax.block_until_ready(a_norm)

    out = gcn_forward(a_norm, x, w1, b1, w2, b2)
    jax.block_until_ready(out)

    assert out.shape == (num_nodes, output_dim)
    # each row of log_softmax output must exp-sum to 1
    assert jnp.allclose(jnp.sum(jnp.exp(out), axis=1), 1.0, atol=1e-4)
    # match pure-JAX f32 reference (loose tolerance: bf16 MXU inputs)
    ref = gcn_reference(a_norm, x, w1, b1, w2, b2)
    assert jnp.allclose(out, ref, atol=1e-1), float(jnp.max(jnp.abs(out - ref)))
    print("KERNEL_OK")
</pallas_src>

<mosaic_0001>
module attributes {stable_mosaic.version = 11 : i64} {
  func.func @gcn_fused_kernel(%arg0: i32, %arg1: memref<16x16xbf16, #tpu.memory_space<vmem>>, %arg2: memref<16x8xbf16, #tpu.memory_space<vmem>>, %arg3: memref<8x32xbf16, #tpu.memory_space<vmem>>, %arg4: memref<1x32xf32, #tpu.memory_space<vmem>>, %arg5: memref<32x128xbf16, #tpu.memory_space<vmem>>, %arg6: memref<1x128xf32, #tpu.memory_space<vmem>>, %arg7: memref<16x128xf32, #tpu.memory_space<vmem>>) attributes {dimension_semantics = [#tpu.dimension_semantics<arbitrary>], iteration_bounds = array<i64: 1>, scalar_prefetch = 0 : i64, scratch_operands = 0 : i64, tpu.core_type = #tpu.core_type<tc>, window_params = [{pipeline_mode = #tpu.pipeline_mode<synchronous>, transform_indices = @transform_0, window_bounds = array<i64: 16, 16>}, {pipeline_mode = #tpu.pipeline_mode<synchronous>, transform_indices = @transform_1, window_bounds = array<i64: 16, 8>}, {pipeline_mode = #tpu.pipeline_mode<synchronous>, transform_indices = @transform_2, window_bounds = array<i64: 8, 32>}, {pipeline_mode = #tpu.pipeline_mode<synchronous>, transform_indices = @transform_3, window_bounds = array<i64: 1, 32>}, {pipeline_mode = #tpu.pipeline_mode<synchronous>, transform_indices = @transform_4, window_bounds = array<i64: 32, 128>}, {pipeline_mode = #tpu.pipeline_mode<synchronous>, transform_indices = @transform_5, window_bounds = array<i64: 1, 128>}, {pipeline_mode = #tpu.pipeline_mode<synchronous>, transform_indices = @transform_6, window_bounds = array<i64: 16, 128>}]} {
    %c0 = arith.constant 0 : index
    %c0_0 = arith.constant 0 : index
    %0 = vector.load %arg1[%c0, %c0_0] : memref<16x16xbf16, #tpu.memory_space<vmem>>, vector<16x16xbf16>
    %c0_1 = arith.constant 0 : index
    %c0_2 = arith.constant 0 : index
    %1 = vector.load %arg2[%c0_1, %c0_2] : memref<16x8xbf16, #tpu.memory_space<vmem>>, vector<16x8xbf16>
    %cst = arith.constant dense<0.000000e+00> : vector<16x8xf32>
    %2 = tpu.matmul %0, %1, %cst {dimension_numbers = #tpu.dot_dimension_numbers<[1], [0], [0], [1], [0, 0, 1, 1], [], []>} : vector<16x16xbf16>, vector<16x8xbf16>, vector<16x8xf32> -> vector<16x8xf32>
    %3 = arith.truncf %2 : vector<16x8xf32> to vector<16x8xbf16>
    %c0_3 = arith.constant 0 : index
    %c0_4 = arith.constant 0 : index
    %4 = vector.load %arg3[%c0_3, %c0_4] : memref<8x32xbf16, #tpu.memory_space<vmem>>, vector<8x32xbf16>
    %cst_5 = arith.constant dense<0.000000e+00> : vector<16x32xf32>
    %5 = tpu.matmul %3, %4, %cst_5 {dimension_numbers = #tpu.dot_dimension_numbers<[1], [0], [0], [1], [0, 0, 1, 1], [], []>} : vector<16x8xbf16>, vector<8x32xbf16>, vector<16x32xf32> -> vector<16x32xf32>
    %c0_6 = arith.constant 0 : index
    %c0_7 = arith.constant 0 : index
    %6 = vector.load %arg4[%c0_6, %c0_7] : memref<1x32xf32, #tpu.memory_space<vmem>>, vector<1x32xf32>
    %7 = vector.broadcast %6 : vector<1x32xf32> to vector<16x32xf32>
    %8 = arith.addf %5, %7 : vector<16x32xf32>
    %cst_8 = arith.constant 0.000000e+00 : f32
    %9 = vector.broadcast %cst_8 : f32 to vector<16x32xf32>
    %10 = arith.maximumf %8, %9 : vector<16x32xf32>
    %11 = arith.truncf %10 : vector<16x32xf32> to vector<16x32xbf16>
    %c0_9 = arith.constant 0 : index
    %c0_10 = arith.constant 0 : index
    %12 = vector.load %arg5[%c0_9, %c0_10] : memref<32x128xbf16, #tpu.memory_space<vmem>>, vector<32x128xbf16>
    %cst_11 = arith.constant dense<0.000000e+00> : vector<16x128xf32>
    %13 = tpu.matmul %11, %12, %cst_11 {dimension_numbers = #tpu.dot_dimension_numbers<[1], [0], [0], [1], [0, 0, 1, 1], [], []>} : vector<16x32xbf16>, vector<32x128xbf16>, vector<16x128xf32> -> vector<16x128xf32>
    %14 = arith.truncf %13 : vector<16x128xf32> to vector<16x128xbf16>
    %cst_12 = arith.constant dense<0.000000e+00> : vector<16x128xf32>
    %15 = tpu.matmul %0, %14, %cst_12 {dimension_numbers = #tpu.dot_dimension_numbers<[1], [0], [0], [1], [0, 0, 1, 1], [], []>} : vector<16x16xbf16>, vector<16x128xbf16>, vector<16x128xf32> -> vector<16x128xf32>
    %c0_13 = arith.constant 0 : index
    %c0_14 = arith.constant 0 : index
    %16 = vector.load %arg6[%c0_13, %c0_14] : memref<1x128xf32, #tpu.memory_space<vmem>>, vector<1x128xf32>
    %17 = vector.broadcast %16 : vector<1x128xf32> to vector<16x128xf32>
    %18 = arith.addf %15, %17 : vector<16x128xf32>
    %cst_15 = arith.constant dense<0xFF800000> : vector<16xf32>
    %19 = vector.multi_reduction <maximumf>, %18, %cst_15 [1] : vector<16x128xf32> to vector<16xf32>
    %20 = vector.shape_cast %19 : vector<16xf32> to vector<16x1xf32>
    %21 = vector.broadcast %20 : vector<16x1xf32> to vector<16x128xf32>
    %22 = arith.subf %18, %21 : vector<16x128xf32>
    %23 = math.exp %22 : vector<16x128xf32>
    %cst_16 = arith.constant dense<0.000000e+00> : vector<16xf32>
    %24 = vector.multi_reduction <add>, %23, %cst_16 [1] : vector<16x128xf32> to vector<16xf32>
    %25 = vector.shape_cast %24 : vector<16xf32> to vector<16x1xf32>
    %26 = math.log %25 : vector<16x1xf32>
    %27 = arith.addf %20, %26 : vector<16x1xf32>
    %28 = vector.broadcast %27 : vector<16x1xf32> to vector<16x128xf32>
    %29 = arith.subf %18, %28 : vector<16x128xf32>
    %c0_17 = arith.constant 0 : index
    %c0_18 = arith.constant 0 : index
    %30 = vector.load %arg7[%c0_17, %c0_18] : memref<16x128xf32, #tpu.memory_space<vmem>>, vector<16x128xf32>
    tpu.vector_store %arg7[%c0_17, %c0_18], %29 {strides = array<i32>} : memref<16x128xf32, #tpu.memory_space<vmem>>, vector<16x128xf32>,
    return
  }
  func.func @transform_0(%arg0: i32) -> (i32, i32) {
    %c0_i32 = arith.constant 0 : i32
    %c0_i32_0 = arith.constant 0 : i32
    %c0_i32_1 = arith.constant 0 : i32
    return %c0_i32, %c0_i32_0 : i32, i32
  }
  func.func @transform_1(%arg0: i32) -> (i32, i32) {
    %c0_i32 = arith.constant 0 : i32
    %c0_i32_0 = arith.constant 0 : i32
    %c0_i32_1 = arith.constant 0 : i32
    return %c0_i32, %c0_i32_0 : i32, i32
  }
  func.func @transform_2(%arg0: i32) -> (i32, i32) {
    %c0_i32 = arith.constant 0 : i32
    %c0_i32_0 = arith.constant 0 : i32
    %c0_i32_1 = arith.constant 0 : i32
    return %c0_i32, %c0_i32_0 : i32, i32
  }
  func.func @transform_3(%arg0: i32) -> (i32, i32) {
    %c0_i32 = arith.constant 0 : i32
    %c0_i32_0 = arith.constant 0 : i32
    %c0_i32_1 = arith.constant 0 : i32
    return %c0_i32, %c0_i32_0 : i32, i32
  }
  func.func @transform_4(%arg0: i32) -> (i32, i32) {
    %c0_i32 = arith.constant 0 : i32
    %c0_i32_0 = arith.constant 0 : i32
    %c0_i32_1 = arith.constant 0 : i32
    return %c0_i32, %c0_i32_0 : i32, i32
  }
  func.func @transform_5(%arg0: i32) -> (i32, i32) {
    %c0_i32 = arith.constant 0 : i32
    %c0_i32_0 = arith.constant 0 : i32
    %c0_i32_1 = arith.constant 0 : i32
    return %c0_i32, %c0_i32_0 : i32, i32
  }
  func.func @transform_6(%arg0: i32) -> (i32, i32) {
    %c0_i32 = arith.constant 0 : i32
    %c0_i32_0 = arith.constant 0 : i32
    %c0_i32_1 = arith.constant 0 : i32
    return %c0_i32, %c0_i32_0 : i32, i32
  }
}

</mosaic_0001>

<bundles_post_ra>
// kernel: gcn_forward.1
= control target key start
LH: loop header
LB: loop body
LE: loop exit
PB: predicated region body
PF: predicated region fallthrough
CT: control target
= control target key end

     0   :  { %11 = vsyncpa [#allocation3], 0  ;;  %s765_s0 = inlined_call_operand.hbm [shape: bf16[16,16], index: 0, kind: input, shape index: {}]   ;;  %s766_s1 = inlined_call_operand.hbm [shape: bf16[16,8], index: 1, kind: input, shape index: {}]   ;;  %s767_s2 = inlined_call_operand.hbm [shape: bf16[8,32], index: 2, kind: input, shape index: {}]   ;;  %s768_s3 = inlined_call_operand.hbm [shape: f32[1,32], index: 3, kind: input, shape index: {}]   ;;  %s769_s4 = inlined_call_operand.hbm [shape: bf16[32,128], index: 4, kind: input, shape index: {}]   ;;  %s770_s5 = inlined_call_operand.hbm [shape: f32[1,128], index: 5, kind: input, shape index: {}]   ;;  %s771_s6 = inlined_call_operand.hbm [shape: f32[16,128], index: 6, kind: output, shape index: {}]  }
   0x1   :  { %12 = vsyncpa [#allocation6], 0 }
   0x2   :  { %13 = vsyncpa [#allocation9], 0 }
   0x3   :  { %14 = vsyncpa [#allocation12], 0 }
   0x4   :  { %15 = vsyncpa [#allocation4], 0  ;;  %s610_s21 = smov [#allocation5]   ;;  %s611_s23 = smov [#allocation8]  }
   0x5   :  { %s33_s22 = sshll.u32 %s610_s21, 4  ;;  %s56_s24 = sshll.u32 %s611_s23, 4  ;;  %s34_s22 = int_to_ptr.vmem [resolvable:$true] %s33_s22  ;;  %s658_s24 = int_to_ptr.vmem [resolvable:$true] %s56_s24 }
   0x6   :  { %s446_s27 = scalar_lea.hbm %s766_s1, 128 }
   0x7   :  { %p447_p0 = scmp.ne.s32.totalorder %s766_s1, %s446_s27  ;;  %p450_p1 = scmp.lt.u32.totalorder %s446_s27, %s766_s1 }
   0x9   :  { %p452_p2 = pnand %p450_p1, %p447_p0 }
   0xb   :  { %455 = shalt.err (!%p452_p2)
}
   0xc   :  { %s456_s8 = scalar_lea.vmem %s34_s22, 128  ;;  %p461_p4 = scmp.lt.s32.totalorder %s34_s22, %s34_s22 }
   0xd   :  { %p457_p3 = scmp.ne.s32.totalorder %s34_s22, %s456_s8  ;;  %p462_p5 = scmp.lt.s32.totalorder %s456_s8, %s456_s8 }
   0xf   :  { %p463_p6 = por %p462_p5, %p461_p4 }
  0x11   :  { %p464_p7 = pnand %p463_p6, %p457_p3 }
  0x13   :  { %467 = shalt.err (!%p464_p7)
}
  0x14   :  { %s612_s9 = smov 64   ;;  %s613_s10 = smov 4  }
  0x15   :  { %39 = dma.hbm_to_vmem [thread:$0]  %s766_s1, 128, %s34_s22, [#allocation6], %s612_s9, %s612_s9, %s613_s10  }
  0x16   :  { %s468_s15 = scalar_lea.hbm %s768_s3, 16 }
  0x17   :  { %p469_p8 = scmp.ne.s32.totalorder %s768_s3, %s468_s15  ;;  %p472_p9 = scmp.lt.u32.totalorder %s468_s15, %s768_s3 }
  0x19   :  { %p474_p10 = pnand %p472_p9, %p469_p8 }
  0x1b   :  { %477 = shalt.err (!%p474_p10)
}
  0x1c   :  { %s478_s20 = scalar_lea.vmem %s658_s24, 16  ;;  %s482_s1 = scalar_lea.vmem %s658_s24, 32 }
  0x1d   :  { %p479_p11 = scmp.ne.s32.totalorder %s658_s24, %s478_s20  ;;  %p483_p12 = scmp.lt.s32.totalorder %s658_s24, %s658_s24 }
  0x1e   :  { %p484_p13 = scmp.lt.s32.totalorder %s482_s1, %s478_s20 }
  0x20   :  { %p485_p0 = por %p484_p13, %p483_p12 }
  0x22   :  { %p486_p1 = pnand %p485_p0, %p479_p11 }
  0x24   :  { %489 = shalt.err (!%p486_p1)
}
  0x25   :  { %59 = dma.hbm_to_vmem [thread:$0]  %s768_s3, 16, %s658_s24, [#allocation9]  }
  0x26   :  { %s614_s23 = smov [#allocation2]   ;;  %s615_s26 = smov [#allocation7]  }
  0x27   :  { %s21_s25 = sshll.u32 %s614_s23, 4  ;;  %s46_s27 = sshll.u32 %s615_s26, 4  ;;  %s22_s25 = int_to_ptr.vmem [resolvable:$true] %s21_s25  ;;  %s47_s27 = int_to_ptr.vmem [resolvable:$true] %s46_s27 }
  0x28   :  { %s490_s30 = scalar_lea.hbm %s765_s0, 128 }
  0x29   :  { %p491_p2 = scmp.ne.s32.totalorder %s765_s0, %s490_s30  ;;  %p494_p3 = scmp.lt.u32.totalorder %s490_s30, %s765_s0 }
  0x2b   :  { %p496_p4 = pnand %p494_p3, %p491_p2 }
  0x2d   :  { %499 = shalt.err (!%p496_p4)
}
  0x2e   :  { %s500_s3 = scalar_lea.vmem %s22_s25, 128  ;;  %p505_p6 = scmp.lt.s32.totalorder %s22_s25, %s22_s25 }
  0x2f   :  { %p501_p5 = scmp.ne.s32.totalorder %s22_s25, %s500_s3  ;;  %p506_p7 = scmp.lt.s32.totalorder %s500_s3, %s500_s3 }
  0x31   :  { %p507_p8 = por %p506_p7, %p505_p6 }
  0x33   :  { %p508_p9 = pnand %p507_p8, %p501_p5 }
  0x35   :  { %511 = shalt.err (!%p508_p9)
}
  0x36   :  { %27 = dma.hbm_to_vmem [thread:$0]  %s765_s0, 128, %s22_s25, [#allocation3], %s612_s9, %s612_s9, %s613_s10  }
  0x37   :  { %s512_s16 = scalar_lea.hbm %s767_s2, 64 }
  0x38   :  { %p513_p10 = scmp.ne.s32.totalorder %s767_s2, %s512_s16  ;;  %p516_p11 = scmp.lt.u32.totalorder %s512_s16, %s767_s2 }
  0x3a   :  { %p518_p12 = pnand %p516_p11, %p513_p10 }
  0x3c   :  { %521 = shalt.err (!%p518_p12)
}
  0x3d   :  { %s522_s1 = scalar_lea.vmem %s47_s27, 64  ;;  %p527_p0 = scmp.lt.s32.totalorder %s47_s27, %s47_s27 }
  0x3e   :  { %p523_p13 = scmp.ne.s32.totalorder %s47_s27, %s522_s1  ;;  %p528_p1 = scmp.lt.s32.totalorder %s522_s1, %s522_s1 }
  0x40   :  { %p529_p2 = por %p528_p1, %p527_p0 }
  0x42   :  { %p530_p3 = pnand %p529_p2, %p523_p13 }
  0x44   :  { %533 = shalt.err (!%p530_p3)
}
  0x45   :  { %49 = dma.hbm_to_vmem [thread:$0]  %s767_s2, 64, %s47_s27, [#allocation6]  }
  0x46   :  { %s616_s22 = smov [#allocation10]   ;;  %s617_s25 = smov [#allocation11]  }
  0x47   :  { %s65_s23 = sshll.u32 %s616_s22, 4  ;;  %s78_s26 = sshll.u32 %s617_s25, 4  ;;  %s66_s23 = int_to_ptr.vmem [resolvable:$true] %s65_s23  ;;  %s79_s26 = int_to_ptr.vmem [resolvable:$true] %s78_s26 }
  0x48   :  { %s534_s30 = scalar_lea.hbm %s769_s4, 256 }
  0x49   :  { %p535_p4 = scmp.ne.s32.totalorder %s769_s4, %s534_s30  ;;  %p538_p5 = scmp.lt.u32.totalorder %s534_s30, %s769_s4 }
  0x4b   :  { %p540_p6 = pnand %p538_p5, %p535_p4 }
  0x4d   :  { %543 = shalt.err (!%p540_p6)
}
  0x4e   :  { %s544_s2 = scalar_lea.vmem %s66_s23, 256  ;;  %p549_p8 = scmp.lt.s32.totalorder %s66_s23, %s66_s23 }
  0x4f   :  { %p545_p7 = scmp.ne.s32.totalorder %s66_s23, %s544_s2  ;;  %p550_p9 = scmp.lt.s32.totalorder %s544_s2, %s544_s2 }
  0x51   :  { %p551_p10 = por %p550_p9, %p549_p8 }
  0x53   :  { %p552_p11 = pnand %p551_p10, %p545_p7 }
  0x55   :  { %555 = shalt.err (!%p552_p11)
}
  0x56   :  { %71 = dma.hbm_to_vmem [thread:$0]  %s769_s4, 256, %s66_s23, [#allocation9], %s612_s9, %s612_s9, %s613_s10  }
  0x57   :  { %s556_s14 = scalar_lea.hbm %s770_s5, 16 }
  0x58   :  { %p557_p12 = scmp.ne.s32.totalorder %s770_s5, %s556_s14  ;;  %p560_p13 = scmp.lt.u32.totalorder %s556_s14, %s770_s5 }
  0x5a   :  { %p562_p0 = pnand %p560_p13, %p557_p12 }
  0x5c   :  { %565 = shalt.err (!%p562_p0)
}
  0x5d   :  { %s566_s19 = scalar_lea.vmem %s79_s26, 16  ;;  %s570_s20 = scalar_lea.vmem %s79_s26, 32 }
  0x5e   :  { %p567_p1 = scmp.ne.s32.totalorder %s79_s26, %s566_s19  ;;  %p571_p2 = scmp.lt.s32.totalorder %s79_s26, %s79_s26 }
  0x5f   :  { %p572_p3 = scmp.lt.s32.totalorder %s570_s20, %s566_s19 }
  0x61   :  { %p573_p4 = por %p572_p3, %p571_p2 }
  0x63   :  { %p574_p5 = pnand %p573_p4, %p567_p1 }
  0x65   :  { %577 = shalt.err (!%p574_p5)
}
  0x66   :  { %81 = dma.hbm_to_vmem [thread:$0]  %s770_s5, 16, %s79_s26, [#allocation12]  }
  0x67   :  { %600 = dma.done.wait [#allocation3], 128  }
  0x68   :  { %601 = vsyncadd [#allocation3], 4294967168 }
  0x69   :  { %602 = dma.done.wait [#allocation6], 192  }
  0x6a   :  { %603 = vsyncadd [#allocation6], 4294967104 }
  0x6b   :  { %604 = dma.done.wait [#allocation9], 272  }
  0x6c   :  { %605 = vsyncadd [#allocation9], 4294967024 }
  0x6d   :  { %606 = dma.done.wait [#allocation12], 16  }
  0x6e   :  { %607 = vsyncadd [#allocation12], 4294967280  ;;  %v618_v0 = vmov 0.0   ;;  %vm619_vm0 = vmmov 0   ;;  %v434_v1 = vld [vmem:[#allocation5] sm:$0xff]   ;;  %v435_v2 = vld [vmem:[#allocation2] sm:$0xff]  }
  0x6f   :  { %395 = vmatprep.subr.bf16.mxu0 %v618_v0  ;;  %397 = vmatprep.mubr.msk.bf16.mxu0 %vm619_vm0, %v618_v0  ;;  %vm116_vm1 = vcmask 130048   ;;  %v162_v3 = vld [vmem:[#allocation7] sm:$0xf]  ;;  %vm174_vm2 = vcmask 1043456   ;;  %vm170_vm3 = vcmask 64512   ;;  %v436_v10 = vld [vmem:[#allocation10] sm:$0xff]  }
  0x70   :  { %401 = vmatprep.subr.bf16.mxu1 %v618_v0  ;;  %403 = vmatprep.mubr.msk.bf16.mxu1 %vm619_vm0, %v618_v0  ;;  %v176_v4 = vsel %vm174_vm2, %v162_v3, 0  ;;  %v437_v11 = vld [vmem:[#allocation10 + $0x8] sm:$0xff]   ;;  %v379_v12 = vld [vmem:[#allocation8] ss:$0 sm:$0xff]  ;;  %vm238_vm4 = vcmask 261120   ;;  %s620_s5 = smov [#allocation13]  }
  0x71   :  { %396 = vmatpush3.bf16.msra.mxu0 %v434_v1  ;;  %402 = vmatpush3.bf16.msra.mxu1 %v176_v4  ;;  %v384_v27 = vld [vmem:[#allocation11] ss:$0 sm:$0xff]  ;;  %s361_s10 = sshll.u32 %s620_s5, 4  ;;  %s362_s10 = int_to_ptr.vmem [resolvable:$true] %s361_s10 }
  0x72   :  { %407 = vmatprep.subr.bf16.mxu0 %v618_v0  ;;  %415 = vmatprep.subr.bf16.mxu1 %v618_v0  ;;  %s578_s1 = scalar_lea.vmem %s362_s10, 256  ;;  %p583_p7 = scmp.lt.s32.totalorder %s362_s10, %s362_s10 }
  0x73   :  { %p579_p6 = scmp.ne.s32.totalorder %s362_s10, %s578_s1  ;;  %p584_p8 = scmp.lt.s32.totalorder %s578_s1, %s578_s1 }
  0x74   :  { %398 = vmatmul.mubr.msk.bf16.vlgmr.msra.gmra.mrb[0].mxu0 %vm116_vm1, %v435_v2 }
  0x75   :  { %411 = vmatprep.mubr.msk.bf16.mxu0 %vm619_vm0, %v618_v0  ;;  %408 = vmatpush3.bf16.msra.mxu0 %v436_v10  ;;  %p585_p9 = por %p584_p8, %p583_p7 }
  0x76   :  { %409 = vmatprep.subr.bf16.mxu0 %v618_v0 }
  0x77   :  { %p586_p10 = pnand %p585_p9, %p579_p6 }
  0x79   :  { %410 = vmatpush3.bf16.msra.mxu0 %v437_v11 }
 0x147   :  { %v154_v5 = vpop.f32.mrb[0].mxu0 }
 0x148   :  { %v399_v6 = vpop.f32.mrb[1].mxu0 }
 0x149   :  { %v157_v7 = vpop.f32.mrb[2].mxu0 }
 0x14a   :  { %v161_v8 = vpack.c.bf16 %v157_v7, %v154_v5  ;;  %v400_v9 = vpop.f32.mrb[3].mxu0 }
 0x14c   :  { %404 = vmatmul.mubr.msk.bf16.vlgmr.msra.gmra.mrb[0].mxu1 %vm170_vm3, %v161_v8 }
 0x14d   :  { %417 = vmatprep.mubr.msk.bf16.mxu1 %vm619_vm0, %v618_v0 }
 0x21f   :  { %v212_v13 = vpop.f32.mrb[0].mxu1 }
 0x220   :  { %v213_v14 = vadd.f32 %v379_v12, %v212_v13  ;;  %v405_v15 = vpop.f32.mrb[1].mxu1 }
 0x221   :  { %v215_v16 = vpop.f32.mrb[2].mxu1 }
 0x222   :  { %v216_v17 = vadd.f32 %v379_v12, %v215_v16  ;;  %v406_v18 = vpop.f32.mrb[3].mxu1  ;;  %v219_v19 = vmax.f32 %v213_v14, 0.0 }
 0x224   :  { %v220_v20 = vmax.f32 %v216_v17, 0.0 }
 0x226   :  { %v221_v21 = vpack.c.bf16 %v220_v20, %v219_v19 }
 0x228   :  { %412 = vmatmul.mubr.msk.bf16.vlgmr.msra.gmra.mrb[4].mxu0 %vm238_vm4, %v221_v21 }
 0x2fb   :  { %v276_v22 = vpop.f32.mrb[4].mxu0 }
 0x2fc   :  { %v413_v23 = vpop.f32.mrb[5].mxu0 }
 0x2fd   :  { %v279_v24 = vpop.f32.mrb[6].mxu0 }
 0x2fe   :  { %v283_v25 = vpack.c.bf16 %v279_v24, %v276_v22  ;;  %v414_v26 = vpop.f32.mrb[7].mxu0 }
 0x300   :  { %416 = vmatpush3.bf16.msra.mxu1 %v283_v25 }
 0x303   :  { %418 = vmatmul.mubr.msk.bf16.vlgmr.msra.gmra.mrb[4].mxu1 %vm116_vm1, %v435_v2 }
 0x3d6   :  { %v325_v28 = vpop.f32.mrb[4].mxu1 }
 0x3d7   :  { %v326_v29 = vadd.f32 %v384_v27, %v325_v28  ;;  %v419_v30 = vpop.f32.mrb[5].mxu1 }
 0x3d8   :  { %v328_v31 = vpop.f32.mrb[6].mxu1 }
 0x3d9   :  { %332 = vmax.xlane.f32.xlu0 %v326_v29  ;;  %v420_v32 = vpop.f32.mrb[7].mxu1  ;;  %v329_v33 = vadd.f32 %v384_v27, %v328_v31 }
 0x3dd   :  { %334 = vmax.xlane.f32.xlu0 %v329_v33 }
 0x466   :  { %v333_v34 = vpop.xlane.xlu0 %332 }
 0x467   :  { %v336_v35 = vsub.f32 %v326_v29, %v333_v34 }
 0x469   :  { %v338_v36 = vmul.f32 1.442695, %v336_v35 }
 0x46a   :  { %v335_v37 = vpop.xlane.xlu0 %334 }
 0x46b   :  { %v337_v38 = vsub.f32 %v329_v33, %v335_v37  ;;  %438 = vpow2.f32 %v338_v36 }
 0x46d   :  { %v340_v39 = vmul.f32 1.442695, %v337_v38 }
 0x46f   :  { %440 = vpow2.f32 %v340_v39 }
 0x475   :  { %v439_v40 = vpop.eup %438 }
 0x476   :  { %342 = vadd.xlane.f32.xlu1 %v439_v40 }
 0x479   :  { %v441_v41 = vpop.eup %440 }
 0x47a   :  { %344 = vadd.xlane.f32.xlu1 %v441_v41 }
 0x503   :  { %v343_v42 = vpop.xlane.xlu1 %342 }
 0x504   :  { %442 = vlog2.f32 %v343_v42 }
 0x507   :  { %v345_v43 = vpop.xlane.xlu1 %344 }
 0x508   :  { %444 = vlog2.f32 %v345_v43 }
 0x50e   :  { %v443_v44 = vpop.eup %442 }
 0x50f   :  { %v347_v45 = vmul.f32 0.6931472, %v443_v44 }
 0x511   :  { %v350_v46 = vadd.f32 %v347_v45, %v333_v34 }
 0x512   :  { %v445_v47 = vpop.eup %444 }
 0x513   :  { %v352_v48 = vsub.f32 %v326_v29, %v350_v46  ;;  %v349_v49 = vmul.f32 0.6931472, %v445_v47 }
 0x515   :  { %354 = vst [vmem:[#allocation13] sm:$0xff] %v352_v48  ;;  %v351_v50 = vadd.f32 %v349_v49, %v335_v37 }
 0x517   :  { %v353_v51 = vsub.f32 %v329_v33, %v351_v50 }
 0x519   :  { %355 = vst [vmem:[#allocation13 + $0x8] sm:$0xff] %v353_v51 }
 0x51a   :  { %589 = shalt.err (!%p586_p10)
}
 0x51b   :  { %s590_s22 = scalar_lea.hbm %s771_s6, 256 }
 0x51c   :  { %p591_p11 = scmp.ne.s32.totalorder %s771_s6, %s590_s22  ;;  %p594_p12 = scmp.lt.u32.totalorder %s590_s22, %s771_s6 }
 0x51e   :  { %p596_p13 = pnand %p594_p12, %p591_p11 }
 0x520   :  { %599 = shalt.err (!%p596_p13)
}
 0x521   :  { %s621_s29 = smov 128   ;;  %s622_s30 = smov 8  }
 0x522   :  { %367 = dma.vmem_to_hbm [thread:$0]  %s362_s10, 256, %s771_s6, [#allocation4], %s621_s29, %s621_s29, %s622_s30  }
 0x523   :  { %608 = dma.done.wait [#allocation4], 256  }
 0x524   :  { %609 = vsyncadd [#allocation4], 4294967040 }
 0x525   :  { %371 = vsyncpa [#allocation3], 1 }
 0x526   :  { %372 = vsyncpa [#allocation6], 1 }
 0x527   :  { %373 = vsyncpa [#allocation9], 1 }
 0x528   :  { %374 = vsyncpa [#allocation12], 1 }
 0x529   :  { %375 = vsyncpa [#allocation4], 1 }

</bundles_post_ra>
